<compile_context>
chip_gen: v7x
topology: tpu7x:2x2x1
jax: 0.10.0
libtpu: 0.0.40
codegen_flags: <defaults>
</compile_context>

<pallas_src>
import functools

import jax
import jax.numpy as jnp
import numpy as np
from jax.experimental import pallas as pl
from jax.experimental.pallas import tpu as pltpu

EPS = 1e-6
IGNORE = 255

# Accumulator row layout (16 rows == two f32 vregs per 128-lane column):
#   0:2   per-class focal BCE, fine level   (2 classes)
#   2:5   per-class focal BCE, middle level (3 classes)
#   5:12  per-class focal BCE, coarse level (7 classes)
#   12    num_valid
#   13    hierarchy (upper + lower) MSE sum
#   14    hierarchy (body) MSE sum
#   15    background MSE sum
_N_ROWS = 16


def _tree_min_kernel(pf_ref, pm_ref, pc_ref, tf_ref, tm_ref, tc_ref,
                     o_ref, acc_ref, *, gamma, hw, tile, padded):
    s = pl.program_id(0)                      # pixel split ("parallel")
    i = pl.program_id(2)                      # pixel tile  ("arbitrary", innermost)
    tiles_per_split = pl.num_programs(2)

    @pl.when(i == 0)
    def _():
        acc_ref[...] = jnp.zeros_like(acc_ref)

    # --- stack the 12 logit channels into one sublane-dense slab -----------
    # concat happens in the (possibly bf16) input dtype, then upcast once.
    logits = jnp.concatenate([pf_ref[...], pm_ref[...], pc_ref[...]], axis=0)
    logits = logits.astype(jnp.float32)                         # (12, T)
    tf = tf_ref[...].astype(jnp.int32)                          # (1, T)
    tm = tm_ref[...].astype(jnp.int32)
    tc = tc_ref[...].astype(jnp.int32)

    valid = (tf != IGNORE).astype(jnp.float32)                  # (1, T)

    # dense sigmoid: 12 exps + 12 divides per pixel column (kept exact —
    # pl.reciprocal(approx=True) would trim VALU Newton FMAs but its error is
    # too close to the 1e-3 validation tolerance of a training loss).
    e = jnp.exp(-logits)
    sig = 1.0 / (1.0 + e)                                       # (12, T)
    oms = e * sig                                               # 1 - sigmoid (reuses divide)

    # stacked one-hot: row r <-> class r / r-2 / r-5 of fine / middle / coarse
    row = jax.lax.broadcasted_iota(jnp.int32, (12, tile), 0)
    tgt = jnp.where(row < 2, tf, jnp.where(row < 5, tm + 2, tc + 5))
    onehot = row == tgt                                         # (12, T) bool

    pt = jnp.where(onehot, sig, oms)
    one_minus_pt = jnp.where(onehot, oms, sig)
    if gamma == 2.0:                      # static python float -> plain square
        fw = one_minus_pt * one_minus_pt
    else:
        fw = jnp.power(one_minus_pt, gamma)
    # single-log focal BCE (identical to the two-term form since onehot is 0/1)
    bce = -fw * jnp.log(pt + EPS)                               # (12, T)

    # --- hierarchy / background terms (small slices of the sigmoid slab) ---
    def hier(pp, cp):
        mc = jnp.max(cp, axis=0, keepdims=True)
        d = pp - jnp.maximum(pp, mc)
        return d * d                                            # (1, T)

    hu = hier(sig[3:4], sig[6:10])        # middle[1] vs coarse[1:5]
    hl = hier(sig[4:5], sig[10:12])       # middle[2] vs coarse[5:7]
    hb = hier(sig[1:2], sig[3:5])         # fine[1]   vs middle[1:3]
    bgd = sig[0:1] - sig[2:3]             # fine[0]   vs middle[0]

    # upper & lower share the same normalizer and loss weight -> one row.
    small = jnp.concatenate([valid, hu + hl, hb, bgd * bgd], axis=0)   # (4, T)

    # one broadcast multiply applies the valid mask to every row
    # (row 12 is valid itself: valid*valid == valid for a 0/1 mask).
    partial = jnp.concatenate([bce, small], axis=0) * valid            # (16, T)

    if padded:
        # only tiles overhanging H*W pay the mask; full tiles take the cheap path.
        g = s * tiles_per_split + i           # logical global tile index
        is_ragged = (g + 1) * tile > hw

        @pl.when(jnp.logical_not(is_ragged))
        def _():
            acc_ref[...] += partial

        @pl.when(is_ragged)
        def _():
            lane = jax.lax.broadcasted_iota(jnp.int32, (1, tile), 1) + g * tile
            # select (not arithmetic): zeroes OOB lanes even if they hold NaN.
            acc_ref[...] += jnp.where(lane < hw, partial, 0.0)
    else:
        acc_ref[...] += partial

    @pl.when(i == tiles_per_split - 1)
    def _():
        o_ref[...] = jnp.sum(acc_ref[...], axis=1, keepdims=True)[None, None]


def tree_min_loss(pred_fine, pred_middle, pred_coarse,
                  target_fine, target_middle, target_coarse,
                  gamma=2.0, max_tile=32768, pixel_splits=None):
    B, _, H, W = pred_fine.shape
    HW = H * W

    # pixel tile: multiple of 128, as large as the (raised) VMEM budget allows.
    tile = max(128, min(max_tile, ((HW + 127) // 128) * 128))
    n_tiles = -(-HW // tile)

    # v7x has 2 TensorCores: guarantee >= 2 "parallel" grid units at tiny batch.
    if pixel_splits is None:
        pixel_splits = 2 if (B == 1 and n_tiles > 1) else 1
    n_splits = max(1, min(pixel_splits, n_tiles))
    tiles_per_split = -(-n_tiles // n_splits)
    padded = (n_splits * tiles_per_split * tile) != HW
    clamp = (n_splits * tiles_per_split) > n_tiles

    # inputs keep their incoming dtypes: reshape is free, no host astype pass
    # (production should feed bf16 preds / uint8 targets; kernel upcasts).
    def flat_pred(p):
        return p.reshape(p.shape[0], p.shape[1], HW)

    def flat_tgt(t):
        return t.reshape(t.shape[0], 1, HW)

    pf, pm, pc = flat_pred(pred_fine), flat_pred(pred_middle), flat_pred(pred_coarse)
    tf, tm, tc = flat_tgt(target_fine), flat_tgt(target_middle), flat_tgt(target_coarse)

    def in_map(s, b, i):
        g = s * tiles_per_split + i
        if clamp:                              # over-hanging tiles re-read the
            g = jnp.minimum(g, n_tiles - 1)    # last valid block; kernel zeroes them.
        return (b, 0, g)

    def in_spec(c):
        return pl.BlockSpec((pl.Squeezed(), c, tile), in_map)

    # raise the scoped-VMEM limit so the big tile fits on every generation
    # (double-buffered 8-sublane-padded inputs + the (16, tile) accumulator).
    pred_b = pred_fine.dtype.itemsize
    tgt_b = target_fine.dtype.itemsize
    vmem_est = tile * (2 * (3 * 8 * pred_b + 3 * 8 * tgt_b) + _N_ROWS * 4)
    vmem_limit = int(min(max(2 * vmem_est, 32 << 20), 48 << 20))

    kern = functools.partial(_tree_min_kernel, gamma=gamma, hw=HW, tile=tile,
                             padded=padded)

    sums = pl.pallas_call(
        kern,
        out_shape=jax.ShapeDtypeStruct((n_splits, B, _N_ROWS, 1), jnp.float32),
        grid_spec=pltpu.PrefetchScalarGridSpec(
            num_scalar_prefetch=0,
            grid=(n_splits, B, tiles_per_split),
            in_specs=[in_spec(2), in_spec(3), in_spec(7),
                      in_spec(1), in_spec(1), in_spec(1)],
            out_specs=pl.BlockSpec((1, 1, _N_ROWS, 1),
                                   lambda s, b, i: (s, b, 0, 0)),
            scratch_shapes=[pltpu.VMEM((_N_ROWS, tile), jnp.float32)],
        ),
        compiler_params=pltpu.CompilerParams(
            dimension_semantics=("parallel", "parallel", "arbitrary"),
            vmem_limit_bytes=vmem_limit),
    )(pf, pm, pc, tf, tm, tc)

    # tiny epilogue: fold splits/batch, group per-class rows into per-level sums.
    t = jnp.sum(sums, axis=(0, 1))[:, 0]                       # (16,)
    n_valid = t[12] + EPS
    loss_fine = (t[0] + t[1]) / (n_valid * 2.0)
    loss_middle = jnp.sum(t[2:5]) / (n_valid * 3.0)
    loss_coarse = jnp.sum(t[5:12]) / (n_valid * 7.0)
    hier_upper_lower = t[13] / n_valid
    hier_body = t[14] / n_valid
    bg_loss = t[15] / float(B * HW)

    return (1.0 * loss_coarse
            + 0.5 * (loss_middle + 0.1 * hier_upper_lower)
            + 0.25 * (loss_fine + 0.1 * hier_body + 0.1 * bg_loss))


# ---------------------------- pure-JAX reference ----------------------------
def _ref_level_loss(pred, target, valid, num_classes, gamma):
    onehot = jnp.transpose(jax.nn.one_hot(target, num_classes, dtype=jnp.float32),
                           (0, 3, 1, 2))                       # (B, C, H, W)
    prob = jax.nn.sigmoid(pred)
    pt = jnp.where(onehot == 1.0, prob, 1.0 - prob)
    fw = (1.0 - pt) ** gamma
    bce = -(onehot * fw * jnp.log(prob + EPS)
            + (1.0 - onehot) * fw * jnp.log(1.0 - prob + EPS))
    num_valid = valid.sum() + EPS
    return (bce * valid[:, None]).sum() / (num_valid * num_classes)


def _ref_hier_loss(parent, children, idx, valid):
    pp = jax.nn.sigmoid(parent)
    cp = jax.nn.sigmoid(children[:, idx])
    mc = jnp.max(cp, axis=1, keepdims=True)
    c = (pp - jnp.maximum(pp, mc)) ** 2
    num_valid = valid.sum() + EPS
    return (c * valid[:, None]).sum() / num_valid


def tree_min_loss_ref(pf, pm, pc, tf, tm, tc, gamma=2.0):
    valid = (tf != IGNORE).astype(jnp.float32)
    lc = _ref_level_loss(pc, tc, valid, 7, gamma)
    lm = _ref_level_loss(pm, tm, valid, 3, gamma)
    lf = _ref_level_loss(pf, tf, valid, 2, gamma)
    hu = _ref_hier_loss(pm[:, 1:2], pc, [1, 2, 3, 4], valid)
    hl = _ref_hier_loss(pm[:, 2:3], pc, [5, 6], valid)
    hb = _ref_hier_loss(pf[:, 1:2], pm, [1, 2], valid)
    bg = ((jax.nn.sigmoid(pf[:, 0:1]) - jax.nn.sigmoid(pm[:, 0:1])) ** 2
          * valid[:, None]).mean()
    return (1.0 * lc + 0.5 * (lm + 0.1 * (hu + hl))
            + 0.25 * (lf + 0.1 * hb + 0.1 * bg))


if __name__ == "__main__":
    def make_inputs(key, B, H, W):
        k1, k2, k3, k4, k5, k6 = jax.random.split(key, 6)
        pred_fine = jax.random.normal(k1, (B, 2, H, W), jnp.float32)
        pred_middle = jax.random.normal(k2, (B, 3, H, W), jnp.float32)
        pred_coarse = jax.random.normal(k3, (B, 7, H, W), jnp.float32)
        target_fine = jax.random.randint(k4, (B, H, W), 0, 2).astype(jnp.int32)
        target_middle = jax.random.randint(k5, (B, H, W), 0, 3).astype(jnp.int32)
        target_coarse = jax.random.randint(k6, (B, H, W), 0, 7).astype(jnp.int32)
        # mark a small patch as ignore (255) to exercise the valid mask
        target_fine = target_fine.at[0, :2, :2].set(IGNORE)
        return (pred_fine, pred_middle, pred_coarse,
                target_fine, target_middle, target_coarse)

    key = jax.random.PRNGKey(0)
    k0, k1, k2 = jax.random.split(key, 3)

    # main config: B=2, 16x16 (single pixel tile, no split)
    args = make_inputs(k0, 2, 16, 16)
    out = jax.block_until_ready(tree_min_loss(*args))
    ref = jax.block_until_ready(tree_min_loss_ref(*args))
    np.testing.assert_allclose(np.asarray(out), np.asarray(ref),
                               rtol=1e-3, atol=1e-5)

    # ragged last tile + pixel-axis split (B=1 -> both v7x cores get work)
    args = make_inputs(k1, 1, 20, 20)
    out = jax.block_until_ready(tree_min_loss(*args, max_tile=128))
    ref = jax.block_until_ready(tree_min_loss_ref(*args))
    np.testing.assert_allclose(np.asarray(out), np.asarray(ref),
                               rtol=1e-3, atol=1e-5)

    # odd tile count: one split has an over-hanging (clamped, fully masked) tile
    args = make_inputs(k2, 1, 24, 24)
    out = jax.block_until_ready(tree_min_loss(*args, max_tile=128))
    ref = jax.block_until_ready(tree_min_loss_ref(*args))
    np.testing.assert_allclose(np.asarray(out), np.asarray(ref),
                               rtol=1e-3, atol=1e-5)

    print("KERNEL_OK")
</pallas_src>

<mosaic_0001>
module attributes {stable_mosaic.version = 11 : i64} {
  func.func @_tree_min_kernel(%arg0: i32, %arg1: i32, %arg2: i32, %arg3: memref<1x2x256xf32, #tpu.memory_space<vmem>>, %arg4: memref<1x3x256xf32, #tpu.memory_space<vmem>>, %arg5: memref<1x7x256xf32, #tpu.memory_space<vmem>>, %arg6: memref<1x1x256xi32, #tpu.memory_space<vmem>>, %arg7: memref<1x1x256xi32, #tpu.memory_space<vmem>>, %arg8: memref<1x1x256xi32, #tpu.memory_space<vmem>>, %arg9: memref<1x1x16x1xf32, #tpu.memory_space<vmem>>, %arg10: memref<16x256xf32, #tpu.memory_space<vmem>>) attributes {dimension_semantics = [#tpu.dimension_semantics<parallel>, #tpu.dimension_semantics<parallel>, #tpu.dimension_semantics<arbitrary>], iteration_bounds = array<i64: 1, 2, 1>, scalar_prefetch = 0 : i64, scratch_operands = 1 : i64, tpu.core_type = #tpu.core_type<tc>, window_params = [{transform_indices = @transform_0, window_bounds = array<i64: 1, 2, 256>}, {transform_indices = @transform_1, window_bounds = array<i64: 1, 3, 256>}, {transform_indices = @transform_2, window_bounds = array<i64: 1, 7, 256>}, {transform_indices = @transform_3, window_bounds = array<i64: 1, 1, 256>}, {transform_indices = @transform_4, window_bounds = array<i64: 1, 1, 256>}, {transform_indices = @transform_5, window_bounds = array<i64: 1, 1, 256>}, {transform_indices = @transform_6, window_bounds = array<i64: 1, 1, 16, 1>}]} {
    %c0_i32 = arith.constant 0 : i32
    %0 = arith.cmpi eq, %arg2, %c0_i32 : i32
    %1 = arith.extui %0 : i1 to i32
    %c0_i32_0 = arith.constant 0 : i32
    %2 = arith.cmpi ne, %1, %c0_i32_0 : i32
    scf.if %2 {
      %cst_33 = arith.constant 0.000000e+00 : f32
      %91 = vector.broadcast %cst_33 : f32 to vector<16x256xf32>
      %c0_34 = arith.constant 0 : index
      %c0_35 = arith.constant 0 : index
      %92 = vector.load %arg10[%c0_34, %c0_35] : memref<16x256xf32, #tpu.memory_space<vmem>>, vector<16x256xf32>
      tpu.vector_store %arg10[%c0_34, %c0_35], %91 {strides = array<i32>} : memref<16x256xf32, #tpu.memory_space<vmem>>, vector<16x256xf32>,
    } else {
    }
    %c0 = arith.constant 0 : index
    %c0_1 = arith.constant 0 : index
    %c0_2 = arith.constant 0 : index
    %3 = vector.load %arg3[%c0, %c0_1, %c0_2] : memref<1x2x256xf32, #tpu.memory_space<vmem>>, vector<1x2x256xf32>
    %4 = vector.shape_cast %3 : vector<1x2x256xf32> to vector<2x256xf32>
    %c0_3 = arith.constant 0 : index
    %c0_4 = arith.constant 0 : index
    %c0_5 = arith.constant 0 : index
    %5 = vector.load %arg4[%c0_3, %c0_4, %c0_5] : memref<1x3x256xf32, #tpu.memory_space<vmem>>, vector<1x3x256xf32>
    %6 = vector.shape_cast %5 : vector<1x3x256xf32> to vector<3x256xf32>
    %c0_6 = arith.constant 0 : index
    %c0_7 = arith.constant 0 : index
    %c0_8 = arith.constant 0 : index
    %7 = vector.load %arg5[%c0_6, %c0_7, %c0_8] : memref<1x7x256xf32, #tpu.memory_space<vmem>>, vector<1x7x256xf32>
    %8 = vector.shape_cast %7 : vector<1x7x256xf32> to vector<7x256xf32>
    %9 = tpu.concatenate %4, %6, %8 in 0 : vector<2x256xf32>, vector<3x256xf32>, vector<7x256xf32> -> vector<12x256xf32>
    %c0_9 = arith.constant 0 : index
    %c0_10 = arith.constant 0 : index
    %c0_11 = arith.constant 0 : index
    %10 = vector.load %arg6[%c0_9, %c0_10, %c0_11] : memref<1x1x256xi32, #tpu.memory_space<vmem>>, vector<1x1x256xi32>
    %11 = vector.shape_cast %10 : vector<1x1x256xi32> to vector<1x256xi32>
    %c0_12 = arith.constant 0 : index
    %c0_13 = arith.constant 0 : index
    %c0_14 = arith.constant 0 : index
    %12 = vector.load %arg7[%c0_12, %c0_13, %c0_14] : memref<1x1x256xi32, #tpu.memory_space<vmem>>, vector<1x1x256xi32>
    %13 = vector.shape_cast %12 : vector<1x1x256xi32> to vector<1x256xi32>
    %c0_15 = arith.constant 0 : index
    %c0_16 = arith.constant 0 : index
    %c0_17 = arith.constant 0 : index
    %14 = vector.load %arg8[%c0_15, %c0_16, %c0_17] : memref<1x1x256xi32, #tpu.memory_space<vmem>>, vector<1x1x256xi32>
    %15 = vector.shape_cast %14 : vector<1x1x256xi32> to vector<1x256xi32>
    %c255_i32 = arith.constant 255 : i32
    %16 = vector.broadcast %c255_i32 : i32 to vector<1x256xi32>
    %17 = arith.cmpi ne, %11, %16 : vector<1x256xi32>
    %18 = arith.extui %17 : vector<1x256xi1> to vector<1x256xi32>
    %19 = arith.sitofp %18 : vector<1x256xi32> to vector<1x256xf32>
    %cst = arith.constant 0.000000e+00 : f32
    %20 = vector.broadcast %cst : f32 to vector<12x256xf32>
    %21 = arith.subf %20, %9 : vector<12x256xf32>
    %22 = math.exp %21 : vector<12x256xf32>
    %cst_18 = arith.constant 1.000000e+00 : f32
    %23 = vector.broadcast %cst_18 : f32 to vector<12x256xf32>
    %24 = arith.addf %23, %22 : vector<12x256xf32>
    %cst_19 = arith.constant 1.000000e+00 : f32
    %25 = vector.broadcast %cst_19 : f32 to vector<12x256xf32>
    %26 = arith.divf %25, %24 : vector<12x256xf32>
    %27 = arith.mulf %22, %26 : vector<12x256xf32>
    %28 = tpu.iota {dimensions = array<i32: 0>} : vector<12x256xi32>
    %c2_i32 = arith.constant 2 : i32
    %29 = vector.broadcast %c2_i32 : i32 to vector<12x256xi32>
    %30 = arith.cmpi slt, %28, %29 : vector<12x256xi32>
    %c5_i32 = arith.constant 5 : i32
    %31 = vector.broadcast %c5_i32 : i32 to vector<12x256xi32>
    %32 = arith.cmpi slt, %28, %31 : vector<12x256xi32>
    %c2_i32_20 = arith.constant 2 : i32
    %33 = vector.broadcast %c2_i32_20 : i32 to vector<1x256xi32>
    %34 = arith.addi %13, %33 : vector<1x256xi32>
    %c5_i32_21 = arith.constant 5 : i32
    %35 = vector.broadcast %c5_i32_21 : i32 to vector<1x256xi32>
    %36 = arith.addi %15, %35 : vector<1x256xi32>
    %37 = vector.shape_cast %34 : vector<1x256xi32> to vector<1x256xi32>
    %38 = vector.broadcast %37 : vector<1x256xi32> to vector<12x256xi32>
    %39 = vector.shape_cast %36 : vector<1x256xi32> to vector<1x256xi32>
    %40 = vector.broadcast %39 : vector<1x256xi32> to vector<12x256xi32>
    %41 = arith.select %32, %38, %40 : vector<12x256xi1>, vector<12x256xi32>
    %42 = vector.shape_cast %11 : vector<1x256xi32> to vector<1x256xi32>
    %43 = vector.broadcast %42 : vector<1x256xi32> to vector<12x256xi32>
    %44 = arith.select %30, %43, %41 : vector<12x256xi1>, vector<12x256xi32>
    %45 = arith.cmpi eq, %28, %44 : vector<12x256xi32>
    %46 = arith.select %45, %26, %27 : vector<12x256xi1>, vector<12x256xf32>
    %47 = arith.select %45, %27, %26 : vector<12x256xi1>, vector<12x256xf32>
    %48 = arith.mulf %47, %47 : vector<12x256xf32>
    %cst_22 = arith.constant 0.000000e+00 : f32
    %49 = vector.broadcast %cst_22 : f32 to vector<12x256xf32>
    %50 = arith.subf %49, %48 : vector<12x256xf32>
    %cst_23 = arith.constant 9.99999997E-7 : f32
    %51 = vector.broadcast %cst_23 : f32 to vector<12x256xf32>
    %52 = arith.addf %46, %51 : vector<12x256xf32>
    %53 = math.log %52 : vector<12x256xf32>
    %54 = arith.mulf %50, %53 : vector<12x256xf32>
    %55 = vector.extract_strided_slice %26 {offsets = [3, 0], sizes = [1, 256], strides = [1, 1]} : vector<12x256xf32> to vector<1x256xf32>
    %56 = vector.extract_strided_slice %26 {offsets = [6, 0], sizes = [4, 256], strides = [1, 1]} : vector<12x256xf32> to vector<4x256xf32>
    %cst_24 = arith.constant dense<0xFF800000> : vector<256xf32>
    %57 = vector.multi_reduction <maximumf>, %56, %cst_24 [0] : vector<4x256xf32> to vector<256xf32>
    %58 = vector.shape_cast %57 : vector<256xf32> to vector<1x256xf32>
    %59 = arith.maximumf %55, %58 : vector<1x256xf32>
    %60 = arith.subf %55, %59 : vector<1x256xf32>
    %61 = arith.mulf %60, %60 : vector<1x256xf32>
    %62 = vector.extract_strided_slice %26 {offsets = [4, 0], sizes = [1, 256], strides = [1, 1]} : vector<12x256xf32> to vector<1x256xf32>
    %63 = vector.extract_strided_slice %26 {offsets = [10, 0], sizes = [2, 256], strides = [1, 1]} : vector<12x256xf32> to vector<2x256xf32>
    %cst_25 = arith.constant dense<0xFF800000> : vector<256xf32>
    %64 = vector.multi_reduction <maximumf>, %63, %cst_25 [0] : vector<2x256xf32> to vector<256xf32>
    %65 = vector.shape_cast %64 : vector<256xf32> to vector<1x256xf32>
    %66 = arith.maximumf %62, %65 : vector<1x256xf32>
    %67 = arith.subf %62, %66 : vector<1x256xf32>
    %68 = arith.mulf %67, %67 : vector<1x256xf32>
    %69 = vector.extract_strided_slice %26 {offsets = [1, 0], sizes = [1, 256], strides = [1, 1]} : vector<12x256xf32> to vector<1x256xf32>
    %70 = vector.extract_strided_slice %26 {offsets = [3, 0], sizes = [2, 256], strides = [1, 1]} : vector<12x256xf32> to vector<2x256xf32>
    %cst_26 = arith.constant dense<0xFF800000> : vector<256xf32>
    %71 = vector.multi_reduction <maximumf>, %70, %cst_26 [0] : vector<2x256xf32> to vector<256xf32>
    %72 = vector.shape_cast %71 : vector<256xf32> to vector<1x256xf32>
    %73 = arith.maximumf %69, %72 : vector<1x256xf32>
    %74 = arith.subf %69, %73 : vector<1x256xf32>
    %75 = arith.mulf %74, %74 : vector<1x256xf32>
    %76 = vector.extract_strided_slice %26 {offsets = [0, 0], sizes = [1, 256], strides = [1, 1]} : vector<12x256xf32> to vector<1x256xf32>
    %77 = vector.extract_strided_slice %26 {offsets = [2, 0], sizes = [1, 256], strides = [1, 1]} : vector<12x256xf32> to vector<1x256xf32>
    %78 = arith.subf %76, %77 : vector<1x256xf32>
    %79 = arith.addf %61, %68 : vector<1x256xf32>
    %80 = arith.mulf %78, %78 : vector<1x256xf32>
    %81 = tpu.concatenate %19, %79, %75, %80 in 0 : vector<1x256xf32>, vector<1x256xf32>, vector<1x256xf32>, vector<1x256xf32> -> vector<4x256xf32>
    %82 = tpu.concatenate %54, %81 in 0 : vector<12x256xf32>, vector<4x256xf32> -> vector<16x256xf32>
    %83 = vector.broadcast %19 : vector<1x256xf32> to vector<16x256xf32>
    %84 = arith.mulf %82, %83 : vector<16x256xf32>
    %c0_27 = arith.constant 0 : index
    %c0_28 = arith.constant 0 : index
    %85 = vector.load %arg10[%c0_27, %c0_28] : memref<16x256xf32, #tpu.memory_space<vmem>>, vector<16x256xf32>
    %86 = arith.addf %85, %84 : vector<16x256xf32>
    %c0_29 = arith.constant 0 : index
    %c0_30 = arith.constant 0 : index
    %87 = vector.load %arg10[%c0_29, %c0_30] : memref<16x256xf32, #tpu.memory_space<vmem>>, vector<16x256xf32>
    tpu.vector_store %arg10[%c0_29, %c0_30], %86 {strides = array<i32>} : memref<16x256xf32, #tpu.memory_space<vmem>>, vector<16x256xf32>,
    %c0_i32_31 = arith.constant 0 : i32
    %88 = arith.cmpi eq, %arg2, %c0_i32_31 : i32
    %89 = arith.extui %88 : i1 to i32
    %c0_i32_32 = arith.constant 0 : i32
    %90 = arith.cmpi ne, %89, %c0_i32_32 : i32
    scf.if %90 {
      %c0_33 = arith.constant 0 : index
      %c0_34 = arith.constant 0 : index
      %91 = vector.load %arg10[%c0_33, %c0_34] : memref<16x256xf32, #tpu.memory_space<vmem>>, vector<16x256xf32>
      %cst_35 = arith.constant dense<0.000000e+00> : vector<16xf32>
      %92 = vector.multi_reduction <add>, %91, %cst_35 [1] : vector<16x256xf32> to vector<16xf32>
      %93 = vector.shape_cast %92 : vector<16xf32> to vector<16x1xf32>
      %94 = vector.shape_cast %93 : vector<16x1xf32> to vector<1x1x16x1xf32>
      %c0_36 = arith.constant 0 : index
      %c0_37 = arith.constant 0 : index
      %c0_38 = arith.constant 0 : index
      %c0_39 = arith.constant 0 : index
      %95 = vector.load %arg9[%c0_36, %c0_37, %c0_38, %c0_39] : memref<1x1x16x1xf32, #tpu.memory_space<vmem>>, vector<1x1x16x1xf32>
      tpu.vector_store %arg9[%c0_36, %c0_37, %c0_38, %c0_39], %94 {strides = array<i32>} : memref<1x1x16x1xf32, #tpu.memory_space<vmem>>, vector<1x1x16x1xf32>,
    } else {
    }
    return
  }
  func.func @transform_0(%arg0: i32, %arg1: i32, %arg2: i32) -> (i32, i32, i32) {
    %c1_i32 = arith.constant 1 : i32
    %0 = arith.muli %arg0, %c1_i32 : i32
    %1 = arith.addi %0, %arg2 : i32
    %c0_i32 = arith.constant 0 : i32
    %c0_i32_0 = arith.constant 0 : i32
    return %arg1, %c0_i32, %1 : i32, i32, i32
  }
  func.func @transform_1(%arg0: i32, %arg1: i32, %arg2: i32) -> (i32, i32, i32) {
    %c1_i32 = arith.constant 1 : i32
    %0 = arith.muli %arg0, %c1_i32 : i32
    %1 = arith.addi %0, %arg2 : i32
    %c0_i32 = arith.constant 0 : i32
    %c0_i32_0 = arith.constant 0 : i32
    return %arg1, %c0_i32, %1 : i32, i32, i32
  }
  func.func @transform_2(%arg0: i32, %arg1: i32, %arg2: i32) -> (i32, i32, i32) {
    %c1_i32 = arith.constant 1 : i32
    %0 = arith.muli %arg0, %c1_i32 : i32
    %1 = arith.addi %0, %arg2 : i32
    %c0_i32 = arith.constant 0 : i32
    %c0_i32_0 = arith.constant 0 : i32
    return %arg1, %c0_i32, %1 : i32, i32, i32
  }
  func.func @transform_3(%arg0: i32, %arg1: i32, %arg2: i32) -> (i32, i32, i32) {
    %c1_i32 = arith.constant 1 : i32
    %0 = arith.muli %arg0, %c1_i32 : i32
    %1 = arith.addi %0, %arg2 : i32
    %c0_i32 = arith.constant 0 : i32
    %c0_i32_0 = arith.constant 0 : i32
    return %arg1, %c0_i32, %1 : i32, i32, i32
  }
  func.func @transform_4(%arg0: i32, %arg1: i32, %arg2: i32) -> (i32, i32, i32) {
    %c1_i32 = arith.constant 1 : i32
    %0 = arith.muli %arg0, %c1_i32 : i32
    %1 = arith.addi %0, %arg2 : i32
    %c0_i32 = arith.constant 0 : i32
    %c0_i32_0 = arith.constant 0 : i32
    return %arg1, %c0_i32, %1 : i32, i32, i32
  }
  func.func @transform_5(%arg0: i32, %arg1: i32, %arg2: i32) -> (i32, i32, i32) {
    %c1_i32 = arith.constant 1 : i32
    %0 = arith.muli %arg0, %c1_i32 : i32
    %1 = arith.addi %0, %arg2 : i32
    %c0_i32 = arith.constant 0 : i32
    %c0_i32_0 = arith.constant 0 : i32
    return %arg1, %c0_i32, %1 : i32, i32, i32
  }
  func.func @transform_6(%arg0: i32, %arg1: i32, %arg2: i32) -> (i32, i32, i32, i32) {
    %c0_i32 = arith.constant 0 : i32
    %c0_i32_0 = arith.constant 0 : i32
    %c0_i32_1 = arith.constant 0 : i32
    return %arg0, %arg1, %c0_i32, %c0_i32_0 : i32, i32, i32, i32
  }
}

</mosaic_0001>

<bundles_post_ra>
// kernel: tpu_custom_call.1
= control target key start
LH: loop header
LB: loop body
LE: loop exit
PB: predicated region body
PF: predicated region fallthrough
CT: control target
= control target key end

     0   :  { %s1132_s21 = smov 0   ;;  %s1134_s22 = smov 0   ;;  %s1321_s0 = inlined_call_operand.vmem [shape: f32[2,2,256], index: 0, kind: input, shape index: {}]   ;;  %s1322_s1 = inlined_call_operand.vmem [shape: f32[2,3,256], index: 1, kind: input, shape index: {}]   ;;  %s1323_s2 = inlined_call_operand.vmem [shape: f32[2,7,256], index: 2, kind: input, shape index: {}]   ;;  %s1324_s3 = inlined_call_operand.vmem [shape: s32[2,1,256], index: 3, kind: input, shape index: {}]   ;;  %s1325_s4 = inlined_call_operand.vmem [shape: s32[2,1,256], index: 4, kind: input, shape index: {}]   ;;  %s1326_s5 = inlined_call_operand.vmem [shape: s32[2,1,256], index: 5, kind: input, shape index: {}]   ;;  %s1327_s6 = inlined_call_operand.vmem [shape: f32[1,2,16,1], index: 6, kind: output, shape index: {}]  }
   0x1   :  { %s1136_s23 = smov 0  }
   0x2 LB: > { %s31_s24 = sadd.s32 1, %s1090_s22  ;;  %p1002_p0 = scmp.ge.s32.totalorder %s1094_s23, 1  ;;  %s1094_s23 = sphi %s1136_s23, %s16_s23   ;;  %s1090_s22 = sphi %s1134_s22, %s1329_s22   ;;  %s1086_s21 = sphi %s1132_s21, %s1328_s21  }
   0x3   : > { %p33_p1 = scmp.ge.s32.totalorder %s31_s24, 2  ;;  %p346_p2 = scmp.lt.s32.totalorder %s1094_s23, 3 }
   0x5   : > { %s1331_s24 = smov (%p33_p1, %s31_s24), 0  ;;  %p347_p3 = pnand %p1002_p0, %p346_p2 }
   0x6   : > { %p434_p4 = scmp.lt.s32.totalorder (!%p347_p3), %s1086_s21, 1  ;;  %vm545_vm0 = vcmask (!%p347_p3), 1041408   ;;  %vm548_vm1 = vcmask (!%p347_p3), 1044480   ;;  %v585_v22 = vlaneseq (!%p347_p3)  ;;  %vm687_vm5 = vcmask (!%p347_p3), 1043458  }
   0x7   : > { %350 = sbr.rel (%p347_p3) target bundleno = 238 (0xee), region = 44  ;;  %vm662_vm6 = vcmask (!%p347_p3), 1047558   ;;  %vm708_vm7 = vcmask (!%p347_p3), 1044483   ;;  %v1096_v52 = vmov (!%p347_p3), 0.0   ;;  %vm776_vm12 = vcmask (!%p347_p3), 1040384  }
   0x8   : > { %v1175_v23 = vshrl.u32 (!%p347_p3), %v585_v22, 7  ;;  %vm781_vm13 = vcmask (!%p347_p3), 1042432   ;;  %vm790_vm14 = vcmask (!%p347_p3), 1043456   ;;  %vm822_vm15 = vcmask (!%p347_p3), 7168  }
   0xa   : > { %v1178_v29 = vsub.s32 (!%p347_p3), 0, %v1175_v23  ;;  %v1184_v32 = vsub.s32 (!%p347_p3), 1, %v1175_v23  ;;  %vm590_vm2 = vcmp.lt.s32.totalorder (!%p347_p3), %v1175_v23, 5  ;;  %vm588_vm3 = vcmp.lt.s32.totalorder (!%p347_p3), %v1175_v23, 2 }
   0xb   : > { %v1201_v49 = vadd.s32 (!%p347_p3), 8, %v1175_v23 }
   0xe   : > { %s1333_s21 = smov (!%p434_p4, %s1086_s21), 1 }
   0xf   : > { %s1018_s25 = sshll.u32 %s1333_s21, 2  ;;  %s1019_s26 = sshll.u32 %s1333_s21, 3 }
  0x10   : > { %s441_s29 = scalar_lea.vmem %s1321_s0, %s1018_s25  ;;  %s453_s8 = scalar_lea.vmem %s1322_s1, %s1019_s26 }
  0x11   : > { %s1020_s9 = sshll.u32 %s1333_s21, 4  ;;  %v1014_v0 = vld.sshfl [vmem:[%s441_s29] sm:$0x33 pattern:$0x76325410]  ;;  %s1009_s13 = sshll.u32 %s1333_s21, 1 }
  0x12   : > { %s465_s12 = scalar_lea.vmem %s1323_s2, %s1020_s9  ;;  %v519_v1 = vld [vmem:[%s453_s8] sm:$0x77]  ;;  %v530_v4 = vcombine.high %v1014_v0, %v1014_v0  ;;  %s487_s16 = scalar_lea.vmem %s1325_s4, %s1009_s13 }
  0x13   : > { %v520_v2 = vld [vmem:[%s465_s12] sm:$0x7f]  ;;  %v521_v3 = vld [vmem:[%s465_s12 + $0x8] sm:$0x7f]  ;;  %v534_v5 = vcombine.high %v519_v1, %v519_v1  ;;  %v535_v6 = vrot.slane %v519_v1, 6  ;;  %s498_s19 = scalar_lea.vmem %s1326_s5, %s1009_s13  ;;  %s476_s26 = scalar_lea.vmem %s1324_s3, %s1009_s13 }
  0x14   : > { %v541_v7 = vrot.slane %v520_v2, 3  ;;  %v542_v8 = vrot.slane %v521_v3, 3  ;;  %v552_v24 = vld [vmem:[%s487_s16] sm:$0x3]  ;;  %s509_s29 = scalar_lea.vmem %s1327_s6, %s1020_s9 }
  0x15   : > { %v536_v9 = vrot.slane %v534_v5, 6  ;;  %v546_v10 = vsel %vm545_vm0, %v1014_v0, %v535_v6  ;;  %v553_v25 = vld [vmem:[%s498_s19] sm:$0x3]  ;;  %v592_v27 = vadd.s32 2, %v552_v24 }
  0x16   : > { %v549_v11 = vsel %vm548_vm1, %v546_v10, %v541_v7  ;;  %v559_v12 = vsub.f32 0.0, %v541_v7  ;;  %v560_v13 = vsub.f32 0.0, %v542_v8  ;;  %v593_v28 = vadd.s32 5, %v553_v25  ;;  %v551_v37 = vld [vmem:[%s476_s26] sm:$0x3] }
  0x17   : > { %v547_v14 = vsel %vm545_vm0, %v530_v4, %v536_v9  ;;  %v557_v15 = vsub.f32 0.0, %v549_v11  ;;  %v597_v39 = vrot.slane %v592_v27, %v1178_v29  ;;  %v601_v41 = vrot.slane %v592_v27, %v1184_v32 }
  0x18   : > { %v550_v16 = vsel %vm548_vm1, %v547_v14, %v542_v8  ;;  %v565_v17 = vmul.f32 1.442695, %v559_v12  ;;  %v567_v18 = vmul.f32 1.442695, %v560_v13  ;;  %v1188_v40 = vrot.slane %v593_v28, %v1178_v29 }
  0x19   : > { %v558_v19 = vsub.f32 0.0, %v550_v16  ;;  %v561_v20 = vmul.f32 1.442695, %v557_v15  ;;  %v1193_v42 = vrot.slane %v593_v28, %v1184_v32  ;;  %v617_v43 = vrot.slane %v551_v37, %v1178_v29 }
  0x1a   : > { %1048 = vpow2.f32 %v565_v17  ;;  %v610_v44 = vsel %vm590_vm2, %v597_v39, %v1188_v40  ;;  %v621_v45 = vrot.slane %v551_v37, %v1184_v32  ;;  %vm554_vm4 = vcmp.ne.s32.totalorder %v551_v37, 255 }
  0x1b   : > { %1050 = vpow2.f32 %v561_v20  ;;  %v563_v21 = vmul.f32 1.442695, %v558_v19  ;;  %v611_v46 = vsel %vm590_vm2, %v601_v41, %v1193_v42  ;;  %v622_v47 = vsel %vm588_vm3, %v617_v43, %v610_v44 }
  0x1c   : > { %1052 = vpow2.f32 %v567_v18  ;;  %v623_v48 = vsel %vm588_vm3, %v621_v45, %v611_v46  ;;  %v1015_v53 = vsel %vm554_vm4, 1.0, %v1096_v52  ;;  %vm626_vm8 = vcmp.eq.s32.totalorder %v1175_v23, %v622_v47 }
  0x1d   : > { %1054 = vpow2.f32 %v563_v21  ;;  %vm627_vm9 = vcmp.eq.s32.totalorder %v1175_v23, %v623_v48  ;;  %vm628_vm10 = vcmp.eq.s32.totalorder %v1201_v49, %v1188_v40  ;;  %vm629_vm11 = vcmp.eq.s32.totalorder %v1201_v49, %v1193_v42 }
  0x24   : > { %v1049_v26 = vpop.eup %1048 }
  0x25   : > { %v1051_v30 = vpop.eup %1050  ;;  %v571_v31 = vadd.f32 1.0, %v1049_v26 }
  0x26   : > { %v1053_v33 = vpop.eup %1052  ;;  %v569_v34 = vadd.f32 1.0, %v1051_v30 }
  0x27   : > { %v1055_v35 = vpop.eup %1054  ;;  %v572_v36 = vadd.f32 1.0, %v1053_v33  ;;  %1056 = vrcp.f32 %v571_v31 }
  0x28   : > { %v570_v38 = vadd.f32 1.0, %v1055_v35  ;;  %1058 = vrcp.f32 %v569_v34  ;;  %v1262_v34 = vrot.slane %v1015_v53, %v1178_v29 }
  0x29   : > { %1060 = vrcp.f32 %v572_v36 }
  0x2a   : > { %1062 = vrcp.f32 %v570_v38 }
  0x31   : > { %v1203_v50 = vpop.eup %1056 }
  0x32   : > { %v1205_v51 = vpop.eup %1058  ;;  %v664_v54 = vsel %vm545_vm0, %v1203_v50, -inf  ;;  %v688_v55 = vsel %vm687_vm5, %v1203_v50, -inf  ;;  %v1233_v3 = vmul.f32 %v1203_v50, %v1049_v26 }
  0x33   : > { %v1212_v56 = vpop.eup %1060  ;;  %v581_v57 = vmul.f32 %v1205_v51, %v1051_v30  ;;  %v663_v58 = vsel %vm662_vm6, %v1205_v51, -inf  ;;  %v689_v59 = vrot.slane %v688_v55, 4  ;;  %v709_v20 = vsel %vm708_vm7, %v1205_v51, -inf }
  0x34   : > { %v1218_v60 = vpop.eup %1062  ;;  %v665_v61 = vmax.f32 %v663_v58, %v664_v54  ;;  %v673_v62 = vsel %vm545_vm0, %v1212_v56, -inf  ;;  %v695_v63 = vsel %vm687_vm5, %v1212_v56, -inf  ;;  %v1236_v7 = vmul.f32 %v1212_v56, %v1053_v33 }
  0x35   : > { %v582_v0 = vmul.f32 %v1218_v60, %v1055_v35  ;;  %v630_v1 = vsel %vm626_vm8, %v1205_v51, %v581_v57  ;;  %v672_v2 = vsel %vm662_vm6, %v1218_v60, -inf  ;;  %v690_v9 = vmax.f32 %v688_v55, %v689_v59 }
  0x36   : > { %v646_v4 = vadd.f32 1e-06, %v630_v1  ;;  %v666_v5 = vrot.slane %v665_v61, 4  ;;  %v674_v6 = vmax.f32 %v672_v2, %v673_v62  ;;  %v696_v10 = vrot.slane %v695_v63, 4 }
  0x37   : > { %v631_v8 = vsel %vm627_vm9, %v1218_v60, %v582_v0  ;;  %v634_v11 = vsel %vm626_vm8, %v581_v57, %v1205_v51  ;;  %v635_v12 = vsel %vm627_vm9, %v582_v0, %v1218_v60  ;;  %v691_v16 = vrot.slane %v690_v9, 2 }
  0x38   : > { %v647_v13 = vadd.f32 1e-06, %v631_v8  ;;  %1064 = vlog2.f32 %v646_v4  ;;  %v667_v14 = vmax.f32 %v665_v61, %v666_v5  ;;  %v675_v15 = vrot.slane %v674_v6, 4 }
  0x39   : > { %v697_v17 = vmax.f32 %v695_v63, %v696_v10  ;;  %v632_v18 = vsel %vm628_vm10, %v1203_v50, %v1233_v3  ;;  %v633_v19 = vsel %vm629_vm11, %v1212_v56, %v1236_v7  ;;  %v692_v23 = vmax.f32 %v690_v9, %v691_v16 }
  0x3a   : > { %1066 = vlog2.f32 %v647_v13  ;;  %v668_v21 = vrot.slane %v667_v14, 2  ;;  %v676_v22 = vmax.f32 %v674_v6, %v675_v15  ;;  %v638_v25 = vmul.f32 %v634_v11, %v634_v11 }
  0x3b   : > { %v698_v24 = vrot.slane %v697_v17, 2  ;;  %v639_v26 = vmul.f32 %v635_v12, %v635_v12  ;;  %v648_v27 = vadd.f32 1e-06, %v632_v18  ;;  %v693_v31 = vrot.slane %v692_v23, 1 }
  0x3c   : > { %v669_v28 = vmax.f32 %v667_v14, %v668_v21  ;;  %v677_v30 = vrot.slane %v676_v22, 2  ;;  %v1265_v35 = vrot.slane %v1015_v53, %v1184_v32  ;;  %v649_v36 = vadd.f32 1e-06, %v633_v19 }
  0x3d   : > { %v699_v33 = vmax.f32 %v697_v17, %v698_v24  ;;  %v710_v37 = vrot.slane %v709_v20, 4  ;;  %v694_v41 = vmax.f32 %v692_v23, %v693_v31  ;;  %v642_v44 = vsub.f32 0.0, %v638_v25 }
  0x3e   : > { %v670_v38 = vrot.slane %v669_v28, 1  ;;  %v678_v39 = vmax.f32 %v676_v22, %v677_v30  ;;  %v643_v45 = vsub.f32 0.0, %v639_v26  ;;  %1068 = vlog2.f32 %v648_v27 }
  0x3f   : > { %v700_v43 = vrot.slane %v699_v33, 1  ;;  %v711_v46 = vmax.f32 %v709_v20, %v710_v37  ;;  %v702_v54 = vmax.f32 %v1205_v51, %v694_v41  ;;  %1070 = vlog2.f32 %v649_v36 }
  0x40   : > { %v671_v47 = vmax.f32 %v669_v28, %v670_v38  ;;  %v679_v48 = vrot.slane %v678_v39, 1  ;;  %v716_v32 = vsel %vm708_vm7, %v1218_v60, -inf  ;;  %v731_v53 = vrot.slane %v1205_v51, 2 }
  0x41   : > { %v701_v52 = vmax.f32 %v699_v33, %v700_v43  ;;  %v712_v55 = vrot.slane %v711_v46, 2  ;;  %v704_v63 = vsub.f32 %v1205_v51, %v702_v54  ;;  %v717_v1 = vrot.slane %v716_v32, 4 }
  0x42   : > { %v1065_v29 = vpop.eup %1064  ;;  %v680_v58 = vmax.f32 %v678_v39, %v679_v48  ;;  %v681_v59 = vmax.f32 %v1205_v51, %v671_v47  ;;  %v735_v2 = vsub.f32 %v1205_v51, %v731_v53  ;;  %v636_v23 = vsel %vm628_vm10, %v1233_v3, %v1203_v50 }
  0x43   : > { %v651_v57 = vmul.f32 0.6931472, %v1065_v29  ;;  %v703_v61 = vmax.f32 %v1218_v60, %v701_v52  ;;  %v713_v0 = vmax.f32 %v711_v46, %v712_v55  ;;  %v706_v10 = vmul.f32 %v704_v63, %v704_v63 }
  0x44   : > { %v1067_v62 = vpop.eup %1066  ;;  %v682_v6 = vmax.f32 %v1218_v60, %v680_v58  ;;  %v683_v8 = vsub.f32 %v1205_v51, %v681_v59  ;;  %v718_v12 = vmax.f32 %v716_v32, %v717_v1  ;;  %v732_v24 = vrot.slane %v1218_v60, 2 }
  0x45   : > { %v653_v4 = vmul.f32 0.6931472, %v1067_v62  ;;  %v658_v5 = vmul.f32 %v651_v57, %v642_v44  ;;  %v705_v9 = vsub.f32 %v1218_v60, %v703_v61  ;;  %v714_v11 = vrot.slane %v713_v0, 1 }
  0x46   : > { %v684_v14 = vsub.f32 %v1218_v60, %v682_v6  ;;  %v685_v15 = vmul.f32 %v683_v8, %v683_v8  ;;  %v739_v18 = vrot.slane %v706_v10, 1  ;;  %v719_v20 = vrot.slane %v718_v12, 2 }
  0x47   : > { %v659_v13 = vmul.f32 %v653_v4, %v643_v45  ;;  %v793_v16 = vmul.f32 %v1262_v34, %v658_v5  ;;  %v707_v17 = vmul.f32 %v705_v9, %v705_v9  ;;  %v715_v19 = vmax.f32 %v713_v0, %v714_v11 }
  0x48   : > { %v686_v21 = vmul.f32 %v684_v14, %v684_v14  ;;  %v1069_v25 = vpop.eup %1068  ;;  %v743_v27 = vadd.f32 %v739_v18, %v685_v15  ;;  %v720_v28 = vmax.f32 %v718_v12, %v719_v20  ;;  %v637_v33 = vsel %vm629_vm11, %v1236_v7, %v1212_v56 }
  0x49   : > { %v794_v22 = vmul.f32 %v1265_v35, %v659_v13  ;;  %v740_v26 = vrot.slane %v707_v17, 1  ;;  %v723_v30 = vmax.f32 %v1205_v51, %v715_v19  ;;  %v745_v36 = vmul.f32 %v735_v2, %v735_v2  ;;  %v1071_v37 = vpop.eup %1070 }
  0x4a   : > { %v760_v40 = vrot.slane %v743_v27, 2  ;;  %v640_v50 = vmul.f32 %v636_v23, %v636_v23  ;;  %v721_v3 = vrot.slane %v720_v28, 1  ;;  %v736_v41 = vsub.f32 %v1218_v60, %v732_v24 }
  0x4b   : > { %v816_v31 = vadd.f32 %v794_v22, %v793_v16  ;;  %v725_v38 = vsub.f32 %v1205_v51, %v723_v30  ;;  %v744_v39 = vadd.f32 %v740_v26, %v686_v21  ;;  %v641_v46 = vmul.f32 %v637_v33, %v637_v33 }
  0x4c   : > { %v722_v43 = vmax.f32 %v720_v28, %v721_v3  ;;  %v777_v45 = vsel %vm776_vm12, %v1262_v34, %v760_v40  ;;  %v772_v47 = vrot.slane %v745_v36, 5  ;;  %v644_v42 = vsub.f32 0.0, %v640_v50 }
  0x4d   : > { %817 = vadd.xlane.f32.xlu0 %v816_v31  ;;  %v727_v44 = vmul.f32 %v725_v38, %v725_v38  ;;  %v655_v49 = vmul.f32 0.6931472, %v1069_v25  ;;  %v761_v48 = vrot.slane %v744_v39, 2  ;;  %v746_v52 = vmul.f32 %v736_v41, %v736_v41 }
  0x4e   : > { %v724_v56 = vmax.f32 %v1218_v60, %v722_v43  ;;  %v645_v29 = vsub.f32 0.0, %v641_v46  ;;  %v657_v32 = vmul.f32 0.6931472, %v1071_v37 }
  0x4f   : > { %v766_v7 = vrot.slane %v727_v44, 7  ;;  %v660_v53 = vmul.f32 %v655_v49, %v644_v42  ;;  %v778_v59 = vsel %vm776_vm12, %v1265_v35, %v761_v48  ;;  %v773_v61 = vrot.slane %v746_v52, 5 }
  0x50   : > { %v726_v51 = vsub.f32 %v1218_v60, %v724_v56  ;;  %v661_v63 = vmul.f32 %v657_v32, %v645_v29 }
  0x51   : > { %v779_v54 = vsel %vm545_vm0, %v777_v45, %v766_v7 }
  0x52   : > { %v782_v55 = vsel %vm781_vm13, %v779_v54, %v772_v47  ;;  %v728_v57 = vmul.f32 %v726_v51, %v726_v51 }
  0x53   : > { %v786_v58 = vrot.slane %v782_v55, 4 }
  0x54   : > { %v767_v62 = vrot.slane %v728_v57, 7 }
  0x55   : > { %v791_v60 = vsel %vm790_vm14, %v660_v53, %v786_v58 }
  0x56   : > { %v780_v0 = vsel %vm545_vm0, %v778_v59, %v767_v62  ;;  %v795_v4 = vmul.f32 %v791_v60, %v1262_v34 }
  0x57   : > { %v783_v1 = vsel %vm781_vm13, %v780_v0, %v773_v61 }
  0x58   : > { %v787_v2 = vrot.slane %v783_v1, 4 }
  0x5a   : > { %v792_v5 = vsel %vm790_vm14, %v661_v63, %v787_v2 }
  0x5b   : > { %v796_v6 = vmul.f32 %v792_v5, %v1265_v35 }
  0x5d   : > { %v819_v8 = vadd.f32 %v796_v6, %v795_v4 }
  0x5f   : > { %820 = vadd.xlane.f32.xlu0 %v819_v8 }
  0xda   : > { %v818_v9 = vpop.xlane.xlu0 %817 }
  0xdb   : > { %823 = vst.msk [vmem:[%s509_s29] sm:$0xff] %vm822_vm15, %v818_v9 }
  0xec   : > { %v821_v10 = vpop.xlane.xlu0 %820 }
  0xed   : > { %824 = vst.msk [vmem:[%s509_s29 + $0x8] sm:$0xff] %vm822_vm15, %v821_v10 }
  0xee PF: > { %s16_s23 = sadd.s32 1, %s1094_s23   ;;  %s1328_s21 = smov %s1090_s22 }
  0xef   : > { %p13_p5 = scmp.ge.s32.totalorder %s16_s23, 4   ;;  %s1329_s22 = smov %s1331_s24 }
  0xf1   :  { %15 = sbr.rel (!%p13_p5) target bundleno = 2 (0x2), region = 97 }

</bundles_post_ra>
